<compile_context>
chip_gen: v6e
topology: v6e:2x2x1
jax: 0.10.0
libtpu: 0.0.40
codegen_flags: <defaults>
</compile_context>

<pallas_src>
import jax
import jax.numpy as jnp
from jax.experimental import pallas as pl
from jax.experimental.pallas import tpu as pltpu


IGNORE_INDEX_DEFAULT = -100
MAX_BLOCK_ROWS = 16384      # above this, tiny-vocab tiles are VPU-bound, not DMA-bound


def _cdiv(a: int, b: int) -> int:
    return -(-a // b)


def _round_up(x: int, m: int) -> int:
    return ((x + m - 1) // m) * m


def _tpu_generation() -> int:
    """Best-effort TPU generation detection (0 = unknown -> conservative sizing)."""
    try:
        kind = jax.devices()[0].device_kind.lower()
    except Exception:
        return 0
    if "v7" in kind or "7x" in kind:
        return 7
    if "v6" in kind:
        return 6
    if "v5" in kind:
        return 5
    return 0


def _make_xent_kernel(ignore_index: int):
    def kernel(t_ref, x_ref, loss_ref, cnt_ref, loss_acc, cnt_acc):
        k = pl.program_id(1)  # reduction step within this part

        @pl.when(k == 0)
        def _init():
            loss_acc[...] = jnp.zeros_like(loss_acc)
            cnt_acc[...] = jnp.zeros_like(cnt_acc)

        x = x_ref[...].astype(jnp.float32)          # (tr, V) logits tile (cast in-kernel)
        tr, v = x.shape

        # Targets arrive lane-dense (1, tr); count valid rows in lane space
        # (tr/128 vreg adds instead of tr/8), then relayout to (tr, 1) for the
        # per-row one-hot gather (cheap XLU work, hidden under the logits DMA).
        t_lanes = t_ref[...]                                                  # (1, tr) int32
        cnt_acc[...] += jnp.sum((t_lanes != ignore_index).astype(jnp.int32),
                                keepdims=True)                                # (1, 1) int32
        t = t_lanes.reshape(tr, 1)                                            # (tr, 1)

        # Row-wise log-sum-exp; reuse shifted = x - m for the target gather
        # (the row max cancels in lse - tgt_logit), saving one (tr, V) pass.
        m = jnp.max(x, axis=-1, keepdims=True)                                # (tr, 1)
        shifted = x - m                                                       # (tr, V)
        lse_shift = jnp.log(jnp.sum(jnp.exp(shifted), axis=-1, keepdims=True))  # (tr, 1)

        col = jax.lax.broadcasted_iota(jnp.int32, (1, v), 1)                  # (1, V)
        tgt_shift = jnp.sum(jnp.where(col == t, shifted, 0.0),
                            axis=-1, keepdims=True)                           # (tr, 1)

        valid = t != ignore_index                                             # (tr, 1)
        row_loss = jnp.where(valid, lse_shift - tgt_shift, 0.0)               # (tr, 1)
        # Per-step scalar partial: same cross-vreg VALU adds as a (tr,1)
        # accumulator would need, but only a (1,1) cell of VMEM.
        loss_acc[...] += jnp.sum(row_loss, keepdims=True)                     # (1, 1)

        @pl.when(k == pl.num_programs(1) - 1)
        def _flush():
            # One lane-dense, unmasked (8,128) store per part.
            loss_ref[...] = jnp.broadcast_to(loss_acc[...], loss_ref.shape)
            cnt_ref[...] = jnp.broadcast_to(cnt_acc[...], cnt_ref.shape)

    return kernel


def _xent_partial_sums(logits, t3d, tr, p_parts, k_steps, total_tiles,
                       ignore_index, vmem_limit):
    """One pallas_call over all row tiles (tail folded in).

    Returns (sum of -log p(target) over valid rows [f32], number of valid rows [i32]).
    """
    n, v = logits.shape
    kernel = _make_xent_kernel(ignore_index)

    # Targets: lane-dense (1, tr) block out of the (tiles, 1, tr) padded array.
    t_map = lambda p, k: (p * k_steps + k, 0, 0)
    # Logits: clamp so the (at most one) redundant grid step re-reads the last
    # real tile instead of issuing a fully out-of-bounds DMA; its rows carry
    # ignore_index targets and are masked in-kernel.  The partially OOB last
    # tile's garbage rows are masked the same way.
    x_map = lambda p, k: (jnp.minimum(p * k_steps + k, total_tiles - 1), 0)

    loss_p, cnt_p = pl.pallas_call(
        kernel,
        out_shape=(jax.ShapeDtypeStruct((p_parts * 8, 128), jnp.float32),
                   jax.ShapeDtypeStruct((p_parts * 8, 128), jnp.int32)),
        grid_spec=pltpu.PrefetchScalarGridSpec(
            num_scalar_prefetch=0,
            grid=(p_parts, k_steps),
            in_specs=[
                pl.BlockSpec((None, 1, tr), t_map),   # lane-dense int32 targets
                pl.BlockSpec((tr, v), x_map),         # contiguous logits row slab
            ],
            out_specs=[
                pl.BlockSpec((8, 128), lambda p, k: (p, 0)),
                pl.BlockSpec((8, 128), lambda p, k: (p, 0)),
            ],
            scratch_shapes=[
                pltpu.VMEM((1, 1), jnp.float32),      # per-part loss partial
                pltpu.VMEM((1, 1), jnp.int32),        # per-part exact valid count
            ],
        ),
        compiler_params=pltpu.CompilerParams(
            dimension_semantics=("parallel", "arbitrary"),
            vmem_limit_bytes=vmem_limit,
        ),
    )(t3d, logits)
    # Every element of part p's (8,128) block equals that part's partial.
    return jnp.sum(loss_p[::8, 0]), jnp.sum(cnt_p[::8, 0])


def sequence_reconstruction_loss(outputs, targets,
                                 ignore_index=IGNORE_INDEX_DEFAULT,
                                 block_rows=None):
    """Mean cross-entropy over flattened (tokens, vocab) logits, ignoring targets == ignore_index."""
    # Same flattening as the PyTorch module (view(-1) / view(N, -1)).
    targets = targets.reshape(-1).astype(jnp.int32)
    n = targets.shape[0]
    logits = outputs.reshape(n, -1)               # metadata-only reshape, no copy
    v = logits.shape[1]

    itemsize = jnp.dtype(logits.dtype).itemsize
    sub = max(8, 32 // itemsize)                  # sublane granularity: 8 f32 / 16 bf16 / 32 int8

    gen = _tpu_generation()
    if gen in (5, 6):                             # 128 MiB physical VMEM
        block_bytes, vmem_limit = 8 * 1024 * 1024, 80 * 1024 * 1024
    else:                                         # v7x (64 MiB per TC) or unknown: conservative
        block_bytes, vmem_limit = 6 * 1024 * 1024, 46 * 1024 * 1024

    if block_rows is None:
        tr = min(MAX_BLOCK_ROWS, block_bytes // max(1, v * itemsize))
    else:
        tr = block_rows
    tr = max(sub, (tr // sub) * sub)
    # Keep >= 2 row tiles so the two-TensorCore ("parallel") split stays active.
    tr = min(tr, max(sub, _round_up(_cdiv(n, 2), sub)))

    total_tiles = _cdiv(n, tr)
    p_parts = 2 if total_tiles >= 2 else 1
    k_steps = _cdiv(total_tiles, p_parts)

    # Pad only the tiny int32 targets to the rectangular grid; padded rows get
    # ignore_index so out-of-bounds / redundant logits rows are masked in-kernel.
    t_pad = p_parts * k_steps * tr - n
    t3d = jnp.pad(targets, (0, t_pad), constant_values=ignore_index)
    t3d = t3d.reshape(p_parts * k_steps, 1, tr)

    loss_sum, cnt = _xent_partial_sums(logits, t3d, tr, p_parts, k_steps,
                                       total_tiles, ignore_index, vmem_limit)
    # Kernel emits raw sums; the single mean divide lives here (matches
    # CrossEntropyLoss 'mean' over non-ignored targets; NaN if all are ignored,
    # which is also PyTorch's behavior).
    return loss_sum / cnt.astype(jnp.float32)


def _ref_xent(outputs, targets, ignore_index=IGNORE_INDEX_DEFAULT):
    """Pure-JAX reference (mirrors torch.nn.CrossEntropyLoss with ignore_index)."""
    targets = targets.reshape(-1).astype(jnp.int32)
    logits = outputs.reshape(targets.shape[0], -1).astype(jnp.float32)
    valid = targets != ignore_index
    logp = jax.nn.log_softmax(logits, axis=-1)
    safe_t = jnp.where(valid, targets, 0)
    picked = jnp.take_along_axis(logp, safe_t[:, None], axis=1)[:, 0]
    return -jnp.sum(jnp.where(valid, picked, 0.0)) / jnp.sum(valid)


if __name__ == "__main__":
    key = jax.random.PRNGKey(0)
    k1, k2, k3, k4 = jax.random.split(key, 4)

    # Small shapes implied by the module: batch=2, seq=8, vocab=32.
    outputs = jax.random.normal(k1, (2, 8, 32), dtype=jnp.float32)
    targets = jax.random.randint(k2, (2, 8), 0, 32, dtype=jnp.int32)
    targets = targets.at[0, 0].set(-100).at[1, 3].set(-100)   # exercise ignore_index

    loss = jax.block_until_ready(sequence_reconstruction_loss(outputs, targets))
    ref = _ref_xent(outputs, targets)
    assert jnp.allclose(loss, ref, rtol=1e-5, atol=1e-5), (loss, ref)

    # Ragged token count + forced small tiles: exercises the folded tail
    # (partial last tile + clamped redundant tile) and the 2-part "parallel" grid.
    outputs2 = jax.random.normal(k3, (4, 75, 160), dtype=jnp.float32)
    targets2 = jax.random.randint(k4, (4, 75), 0, 160, dtype=jnp.int32)
    targets2 = targets2.at[0, :5].set(-100)
    loss2 = jax.block_until_ready(
        sequence_reconstruction_loss(outputs2, targets2, block_rows=64))
    ref2 = _ref_xent(outputs2, targets2)
    assert jnp.allclose(loss2, ref2, rtol=1e-5, atol=1e-5), (loss2, ref2)

    print("KERNEL_OK")
</pallas_src>

<mosaic_0001>
module attributes {stable_mosaic.version = 11 : i64} {
  func.func @kernel(%arg0: i32, %arg1: i32, %arg2: memref<1x1x8xi32, #tpu.memory_space<vmem>>, %arg3: memref<8x32xf32, #tpu.memory_space<vmem>>, %arg4: memref<8x128xf32, #tpu.memory_space<vmem>>, %arg5: memref<8x128xi32, #tpu.memory_space<vmem>>, %arg6: memref<1x1xf32, #tpu.memory_space<vmem>>, %arg7: memref<1x1xi32, #tpu.memory_space<vmem>>) attributes {dimension_semantics = [#tpu.dimension_semantics<parallel>, #tpu.dimension_semantics<arbitrary>], iteration_bounds = array<i64: 2, 1>, scalar_prefetch = 0 : i64, scratch_operands = 2 : i64, tpu.core_type = #tpu.core_type<tc>, window_params = [{transform_indices = @transform_0, window_bounds = array<i64: 1, 1, 8>}, {transform_indices = @transform_1, window_bounds = array<i64: 8, 32>}, {transform_indices = @transform_2, window_bounds = array<i64: 8, 128>}, {transform_indices = @transform_3, window_bounds = array<i64: 8, 128>}]} {
    %c0_i32 = arith.constant 0 : i32
    %0 = arith.cmpi eq, %arg1, %c0_i32 : i32
    %1 = arith.extui %0 : i1 to i32
    %c0_i32_0 = arith.constant 0 : i32
    %2 = arith.cmpi ne, %1, %c0_i32_0 : i32
    scf.if %2 {
      %cst_22 = arith.constant 0.000000e+00 : f32
      %50 = vector.broadcast %cst_22 : f32 to vector<1x1xf32>
      %c0_23 = arith.constant 0 : index
      %c0_24 = arith.constant 0 : index
      %51 = vector.load %arg6[%c0_23, %c0_24] : memref<1x1xf32, #tpu.memory_space<vmem>>, vector<1x1xf32>
      tpu.vector_store %arg6[%c0_23, %c0_24], %50 {strides = array<i32>} : memref<1x1xf32, #tpu.memory_space<vmem>>, vector<1x1xf32>,
      %c0_i32_25 = arith.constant 0 : i32
      %52 = vector.broadcast %c0_i32_25 : i32 to vector<1x1xi32>
      %c0_26 = arith.constant 0 : index
      %c0_27 = arith.constant 0 : index
      %53 = vector.load %arg7[%c0_26, %c0_27] : memref<1x1xi32, #tpu.memory_space<vmem>>, vector<1x1xi32>
      tpu.vector_store %arg7[%c0_26, %c0_27], %52 {strides = array<i32>} : memref<1x1xi32, #tpu.memory_space<vmem>>, vector<1x1xi32>,
    } else {
    }
    %c0 = arith.constant 0 : index
    %c0_1 = arith.constant 0 : index
    %3 = vector.load %arg3[%c0, %c0_1] : memref<8x32xf32, #tpu.memory_space<vmem>>, vector<8x32xf32>
    %c0_2 = arith.constant 0 : index
    %c0_3 = arith.constant 0 : index
    %c0_4 = arith.constant 0 : index
    %4 = vector.load %arg2[%c0_2, %c0_3, %c0_4] : memref<1x1x8xi32, #tpu.memory_space<vmem>>, vector<1x1x8xi32>
    %5 = vector.shape_cast %4 : vector<1x1x8xi32> to vector<1x8xi32>
    %c0_5 = arith.constant 0 : index
    %c0_6 = arith.constant 0 : index
    %6 = vector.load %arg7[%c0_5, %c0_6] : memref<1x1xi32, #tpu.memory_space<vmem>>, vector<1x1xi32>
    %c-100_i32 = arith.constant -100 : i32
    %7 = vector.broadcast %c-100_i32 : i32 to vector<1x8xi32>
    %8 = arith.cmpi ne, %5, %7 : vector<1x8xi32>
    %9 = arith.extui %8 : vector<1x8xi1> to vector<1x8xi32>
    %10 = vector.shape_cast %9 : vector<1x8xi32> to vector<1x1x8xi32>
    %cst = arith.constant dense<0> : vector<1xi32>
    %11 = vector.multi_reduction <add>, %10, %cst [1, 2] : vector<1x1x8xi32> to vector<1xi32>
    %12 = vector.shape_cast %11 : vector<1xi32> to vector<1x1x1xi32>
    %13 = vector.extract %12[0, 0, 0] : i32 from vector<1x1x1xi32>
    %14 = vector.broadcast %13 : i32 to vector<1x1xi32>
    %15 = arith.addi %6, %14 : vector<1x1xi32>
    %c0_7 = arith.constant 0 : index
    %c0_8 = arith.constant 0 : index
    %16 = vector.load %arg7[%c0_7, %c0_8] : memref<1x1xi32, #tpu.memory_space<vmem>>, vector<1x1xi32>
    tpu.vector_store %arg7[%c0_7, %c0_8], %15 {strides = array<i32>} : memref<1x1xi32, #tpu.memory_space<vmem>>, vector<1x1xi32>,
    %17 = vector.shape_cast %5 : vector<1x8xi32> to vector<8x1xi32>
    %cst_9 = arith.constant dense<0xFF800000> : vector<8xf32>
    %18 = vector.multi_reduction <maximumf>, %3, %cst_9 [1] : vector<8x32xf32> to vector<8xf32>
    %19 = vector.shape_cast %18 : vector<8xf32> to vector<8x1xf32>
    %20 = vector.broadcast %19 : vector<8x1xf32> to vector<8x32xf32>
    %21 = arith.subf %3, %20 : vector<8x32xf32>
    %22 = math.exp %21 : vector<8x32xf32>
    %cst_10 = arith.constant dense<0.000000e+00> : vector<8xf32>
    %23 = vector.multi_reduction <add>, %22, %cst_10 [1] : vector<8x32xf32> to vector<8xf32>
    %24 = vector.shape_cast %23 : vector<8xf32> to vector<8x1xf32>
    %25 = math.log %24 : vector<8x1xf32>
    %26 = tpu.iota {dimensions = array<i32: 1>} : vector<1x32xi32>
    %27 = vector.broadcast %26 : vector<1x32xi32> to vector<8x32xi32>
    %28 = vector.broadcast %17 : vector<8x1xi32> to vector<8x32xi32>
    %29 = arith.cmpi eq, %27, %28 : vector<8x32xi32>
    %cst_11 = arith.constant 0.000000e+00 : f32
    %30 = vector.broadcast %cst_11 : f32 to vector<8x32xf32>
    %31 = arith.select %29, %21, %30 : vector<8x32xi1>, vector<8x32xf32>
    %cst_12 = arith.constant dense<0.000000e+00> : vector<8xf32>
    %32 = vector.multi_reduction <add>, %31, %cst_12 [1] : vector<8x32xf32> to vector<8xf32>
    %33 = vector.shape_cast %32 : vector<8xf32> to vector<8x1xf32>
    %c-100_i32_13 = arith.constant -100 : i32
    %34 = vector.broadcast %c-100_i32_13 : i32 to vector<8x1xi32>
    %35 = arith.cmpi ne, %17, %34 : vector<8x1xi32>
    %36 = arith.subf %25, %33 : vector<8x1xf32>
    %cst_14 = arith.constant 0.000000e+00 : f32
    %37 = vector.broadcast %cst_14 : f32 to vector<8x1xf32>
    %38 = arith.select %35, %36, %37 : vector<8x1xi1>, vector<8x1xf32>
    %c0_15 = arith.constant 0 : index
    %c0_16 = arith.constant 0 : index
    %39 = vector.load %arg6[%c0_15, %c0_16] : memref<1x1xf32, #tpu.memory_space<vmem>>, vector<1x1xf32>
    %40 = vector.shape_cast %38 : vector<8x1xf32> to vector<1x8x1xf32>
    %cst_17 = arith.constant dense<0.000000e+00> : vector<1xf32>
    %41 = vector.multi_reduction <add>, %40, %cst_17 [1, 2] : vector<1x8x1xf32> to vector<1xf32>
    %42 = vector.shape_cast %41 : vector<1xf32> to vector<1x1x1xf32>
    %43 = vector.extract %42[0, 0, 0] : f32 from vector<1x1x1xf32>
    %44 = vector.broadcast %43 : f32 to vector<1x1xf32>
    %45 = arith.addf %39, %44 : vector<1x1xf32>
    %c0_18 = arith.constant 0 : index
    %c0_19 = arith.constant 0 : index
    %46 = vector.load %arg6[%c0_18, %c0_19] : memref<1x1xf32, #tpu.memory_space<vmem>>, vector<1x1xf32>
    tpu.vector_store %arg6[%c0_18, %c0_19], %45 {strides = array<i32>} : memref<1x1xf32, #tpu.memory_space<vmem>>, vector<1x1xf32>,
    %c0_i32_20 = arith.constant 0 : i32
    %47 = arith.cmpi eq, %arg1, %c0_i32_20 : i32
    %48 = arith.extui %47 : i1 to i32
    %c0_i32_21 = arith.constant 0 : i32
    %49 = arith.cmpi ne, %48, %c0_i32_21 : i32
    scf.if %49 {
      %c0_22 = arith.constant 0 : index
      %c0_23 = arith.constant 0 : index
      %50 = vector.load %arg6[%c0_22, %c0_23] : memref<1x1xf32, #tpu.memory_space<vmem>>, vector<1x1xf32>
      %51 = vector.shape_cast %50 : vector<1x1xf32> to vector<1x1xf32>
      %52 = vector.broadcast %51 : vector<1x1xf32> to vector<8x128xf32>
      %c0_24 = arith.constant 0 : index
      %c0_25 = arith.constant 0 : index
      %53 = vector.load %arg4[%c0_24, %c0_25] : memref<8x128xf32, #tpu.memory_space<vmem>>, vector<8x128xf32>
      tpu.vector_store %arg4[%c0_24, %c0_25], %52 {strides = array<i32>} : memref<8x128xf32, #tpu.memory_space<vmem>>, vector<8x128xf32>,
      %c0_26 = arith.constant 0 : index
      %c0_27 = arith.constant 0 : index
      %54 = vector.load %arg7[%c0_26, %c0_27] : memref<1x1xi32, #tpu.memory_space<vmem>>, vector<1x1xi32>
      %55 = vector.shape_cast %54 : vector<1x1xi32> to vector<1x1xi32>
      %56 = vector.broadcast %55 : vector<1x1xi32> to vector<8x128xi32>
      %c0_28 = arith.constant 0 : index
      %c0_29 = arith.constant 0 : index
      %57 = vector.load %arg5[%c0_28, %c0_29] : memref<8x128xi32, #tpu.memory_space<vmem>>, vector<8x128xi32>
      tpu.vector_store %arg5[%c0_28, %c0_29], %56 {strides = array<i32>} : memref<8x128xi32, #tpu.memory_space<vmem>>, vector<8x128xi32>,
    } else {
    }
    return
  }
  func.func @transform_0(%arg0: i32, %arg1: i32) -> (i32, i32, i32) {
    %c1_i32 = arith.constant 1 : i32
    %0 = arith.muli %arg0, %c1_i32 : i32
    %1 = arith.addi %0, %arg1 : i32
    %c0_i32 = arith.constant 0 : i32
    %c0_i32_0 = arith.constant 0 : i32
    %c0_i32_1 = arith.constant 0 : i32
    return %1, %c0_i32, %c0_i32_0 : i32, i32, i32
  }
  func.func @transform_1(%arg0: i32, %arg1: i32) -> (i32, i32) {
    %c1_i32 = arith.constant 1 : i32
    %0 = arith.muli %arg0, %c1_i32 : i32
    %1 = arith.addi %0, %arg1 : i32
    %c1_i32_0 = arith.constant 1 : i32
    %2 = arith.minsi %1, %c1_i32_0 : i32
    %c0_i32 = arith.constant 0 : i32
    %c0_i32_1 = arith.constant 0 : i32
    return %2, %c0_i32 : i32, i32
  }
  func.func @transform_2(%arg0: i32, %arg1: i32) -> (i32, i32) {
    %c0_i32 = arith.constant 0 : i32
    %c0_i32_0 = arith.constant 0 : i32
    return %arg0, %c0_i32 : i32, i32
  }
  func.func @transform_3(%arg0: i32, %arg1: i32) -> (i32, i32) {
    %c0_i32 = arith.constant 0 : i32
    %c0_i32_0 = arith.constant 0 : i32
    return %arg0, %c0_i32 : i32, i32
  }
}

</mosaic_0001>

<bundles_post_ra>
// kernel: tpu_custom_call.1
= control target key start
LH: loop header
LB: loop body
LE: loop exit
PB: predicated region body
PF: predicated region fallthrough
CT: control target
= control target key end

     0   :  { %s1126_s0 = inlined_call_operand.hbm [shape: s32[2,1,8], index: 0, kind: input, shape index: {}]   ;;  %s1127_s1 = inlined_call_operand.hbm [shape: f32[16,32], index: 1, kind: input, shape index: {}]   ;;  %s1128_s2 = inlined_call_operand.hbm [shape: f32[16,128], index: 2, kind: output, shape index: {0}]   ;;  %s1129_s3 = inlined_call_operand.hbm [shape: s32[16,128], index: 3, kind: output, shape index: {1}]  }
   0x1   :  { %1133 = sst [smem:[#allocation17_spill]] %s1126_s0 }
   0x2   :  { %9 = vsyncpa [#allocation5], 0 }
   0x3   :  { %11 = vsyncpa [#allocation5 + $0x1], 0 }
   0x4   :  { %12 = vsyncpa [#allocation8], 0 }
   0x5   :  { %14 = vsyncpa [#allocation8 + $0x1], 0 }
   0x6   :  { %15 = vsyncpa [#allocation6], 0 }
   0x7   :  { %17 = vsyncpa [#allocation6 + $0x1], 0 }
   0x8   :  { %18 = vsyncpa [#allocation11], 0 }
   0x9   :  { %20 = vsyncpa [#allocation11 + $0x1], 0  ;;  %s875_s12 = smov 0   ;;  %s877_s13 = smov 0  }
   0xa   :  { %s879_s14 = smov 0   ;;  %s881_s15 = smov 0  }
   0xb   :  { %s883_s16 = smov 0   ;;  %s885_s17 = smov 0  }
   0xc   :  { %s887_s18 = smov 0   ;;  %s889_s19 = smov 0  }
   0xd   :  { %s891_s20 = smov 0  }
   0xe LB: > { %s526_s21 = sadd.s32 4294967295, %s847_s20   ;;  %s527_s22 = sadd.s32 4294967294, %s847_s20   ;;  %s847_s20 = sphi %s891_s20, %s26_s20   ;;  %s843_s19 = sphi %s889_s19, %s1157_s19   ;;  %s839_s18 = sphi %s887_s18, %s1156_s18   ;;  %s835_s17 = sphi %s885_s17, %s1155_s17   ;;  %s831_s16 = sphi %s883_s16, %s1154_s16   ;;  %s827_s15 = sphi %s881_s15, %s1153_s15   ;;  %s823_s14 = sphi %s879_s14, %s1152_s14   ;;  %s819_s13 = sphi %s877_s13, %s1151_s13   ;;  %s815_s12 = sphi %s875_s12, %s1150_s12  }
   0xf   : > { %s38_s23 = sadd.s32 1, %s843_s19  ;;  %s47_s24 = sadd.s32 1, %s835_s17 }
  0x10   : > { %p40_p0 = scmp.ge.s32.totalorder %s38_s23, 2  ;;  %p54_p1 = scmp.ne.s32.totalorder %s835_s17, %s831_s16 }
  0x11   : > { %p1130_p2 = scmp.eq.s32.totalorder %s847_s20, 0  ;;  %p60_p3 = scmp.ne.s32.totalorder %s831_s16, %s827_s15 }
  0x12   : > { %s1159_s23 = smov (%p40_p0, %s38_s23), 0  ;;  %p937_p5 = scmp.eq.s32.totalorder %s526_s21, 0 }
  0x13   : > { %1134 = sst [smem:[#allocation16_spill]] %s1159_s23  ;;  %p933_p4 = por %p1130_p2, %p54_p1 }
  0x14   : > { %s44_s27 = ssub.s32 %s843_s19, %s1159_s23  ;;  %p116_p6 = scmp.eq.s32.totalorder %s526_s21, 1 }
  0x15   : > { %p45_p7 = scmp.eq.s32.totalorder %s44_s27, 0  ;;  %p945_p8 = por %p937_p5, %p60_p3 }
  0x16   : > { %p949_p9 = por %p116_p6, %p54_p1  ;;  %p122_p10 = scmp.eq.s32.totalorder %s527_s22, 1 }
  0x17   : > { %s954_s30 = scalar_select %p45_p7, %s835_s17, %s47_s24  }
  0x18   : > { %p956_p11 = por %p122_p10, %p60_p3  ;;  %p1131_p13 = scmp.lt.s32.totalorder %s847_s20, 2 }
  0x19   : > { %s168_s5 = sand.u32 1, %s835_s17   ;;  %s530_s6 = sshll.u32 %s843_s19, 4 }
  0x1a   : > { %s1139_s4 = scalar_select %p956_p11, 1, 0 }
  0x1b   : > { %s171_s7 = scalar_lea.vmem [#allocation4], %s168_s5  ;;  %s1140_s0 = sld [smem:[#allocation17_spill]] }
  0x1c   : > { %s179_s8 = sshll.u32 %s171_s7, 4  ;;  %p971_p0 = pnand %p1131_p13, %p933_p4  ;;  %s180_s8 = int_to_ptr.vmem [resolvable:$true] %s179_s8 }
  0x1d   : > { %p533_p1 = scmp.ge.s32.totalorder %s847_s20, 1  ;;  %p205_p3 = scmp.lt.s32.totalorder %s847_s20, 3 }
  0x1e   : > { %s169_s22 = scalar_lea.sflag [#allocation5], %s168_s5  ;;  %p655_p6 = pneg %p971_p0 }
  0x1f   : > { %s666_s24 = scalar_lea.vmem %s180_s8, 16  ;;  %s849_s27 = smov [#allocation4]  }
  0x20   : > { %p667_p7 = scmp.ne.s32.totalorder %s180_s8, %s666_s24  ;;  %s671_s7 = sshll.u32 %s849_s27, 4  ;;  %s672_s7 = int_to_ptr.vmem [resolvable:$false] %s671_s7 }
  0x21   : > { %s177_s11 = scalar_lea.hbm %s1140_s0, %s530_s6  ;;  %s673_s6 = scalar_lea.vmem %s672_s7, 32 }
  0x22   : > { %p669_p10 = pnand %p667_p7, %p655_p6  ;;  %p674_p2 = scmp.lt.s32.totalorder %s180_s8, %s672_s7 }
  0x23   : > { %p675_p11 = scmp.lt.s32.totalorder %s673_s6, %s666_s24 }
  0x24   : > { %p670_p12 = pneg %p669_p10 }
  0x25   : > { %p676_p4 = por %p675_p11, %p674_p2 }
  0x27   : > { %p677_p13 = pnand %p676_p4, %p670_p12 }
  0x29   : > { %680 = shalt.err (!%p677_p13)
}
  0x2a   : > { %560 = dma.hbm_to_vmem [thread:$0]  (!%p971_p0), %s177_s11, 16, %s180_s8, %s169_s22  }
  0x2b   : > { %p985_p2 = pnand %p533_p1, %p205_p3  ;;  %p71_p11 = scmp.lt.s32.totalorder %s843_s19, 1 }
  0x2c   : > { %p74_p12 = scmp.lt.s32.totalorder %s1159_s23, 1  ;;  %s79_s5 = sadd.s32 1, %s823_s14 }
  0x2d   : > { %s72_s9 = scalar_select %p71_p11, %s843_s19, 1 }
  0x2e   : > { %s75_s10 = scalar_select %p74_p12, %s1159_s23, 1 }
  0x2f   : > { %p86_p13 = scmp.ne.s32.totalorder %s823_s14, %s819_s13  ;;  %p92_p6 = scmp.ne.s32.totalorder %s819_s13, %s815_s12 }
  0x30   : > { %s76_s21 = ssub.s32 %s72_s9, %s75_s10  ;;  %s186_s24 = sand.u32 1, %s823_s14  }
  0x31   : > { %p77_p7 = scmp.eq.s32.totalorder %s76_s21, 0  ;;  %p1143_p10 = scmp.eq.s32.totalorder %s847_s20, 0 }
  0x32   : > { %p1003_p0 = por %p92_p6, %p937_p5  ;;  %s531_s22 = sshll.u32 %s186_s24, 3 }
  0x33   : > { %p88_p4 = por %p86_p13, %p1143_p10  ;;  %s532_s27 = sshll.u32 %s72_s9, 7 }
  0x34   : > { %s1008_s11 = scalar_select %p77_p7, %s823_s14, %s79_s5  }
  0x35   : > { %s198_s0 = scalar_lea.hbm %s1127_s1, %s532_s27  ;;  %s190_s23 = scalar_lea.vmem [#allocation7], %s531_s22 }
  0x36   : > { %s200_s12 = sshll.u32 %s190_s23, 4  ;;  %p1145_p1 = scmp.lt.s32.totalorder %s847_s20, 2  ;;  %s201_s12 = int_to_ptr.vmem [resolvable:$true] %s200_s12 }
  0x37   : > { %s187_s26 = scalar_lea.sflag [#allocation8], %s186_s24  ;;  %s694_s5 = scalar_lea.vmem %s201_s12, 128 }
  0x38   : > { %p1015_p3 = pnand %p1145_p1, %p88_p4  ;;  %p695_p11 = scmp.ne.s32.totalorder %s201_s12, %s694_s5 }
  0x39   : > { %s850_s9 = smov [#allocation7]  }
  0x3a   : > { %p683_p5 = pneg %p1015_p3  ;;  %s699_s21 = sshll.u32 %s850_s9, 4  ;;  %s700_s21 = int_to_ptr.vmem [resolvable:$false] %s699_s21 }
  0x3b   : > { %s701_s27 = scalar_lea.vmem %s700_s21, 256  ;;  %p702_p6 = scmp.lt.s32.totalorder %s201_s12, %s700_s21 }
  0x3c   : > { %p697_p12 = pnand %p695_p11, %p683_p5  ;;  %p703_p7 = scmp.lt.s32.totalorder %s701_s27, %s694_s5 }
  0x3e   : > { %p698_p13 = pneg %p697_p12  ;;  %p704_p10 = por %p703_p7, %p702_p6 }
  0x40   : > { %p705_p4 = pnand %p704_p10, %p698_p13 }
  0x42   : > { %708 = shalt.err (!%p705_p4)
}
  0x43   : > { %563 = dma.hbm_to_vmem [thread:$0]  (!%p1015_p3), %s198_s0, 128, %s201_s12, %s187_s26  }
  0x44   : > { %209 = sbr.rel (%p985_p2) target bundleno = 748 (0x2ec), region = 28  ;;  %s1026_s23 = sand.u32 (!%p985_p2), 1, %s831_s16  }
  0x45   : > { %s212_s24 = scalar_lea.sflag (!%p985_p2), [#allocation5], %s1026_s23  ;;  %s214_s22 = scalar_lea.vmem (!%p985_p2), [#allocation4], %s1026_s23 }
  0x49   : > { %798 = dma.done.wait (%p945_p8), %s212_s24, 16  }
  0x4a   : > { %800 = vsyncadd (%p945_p8), %s212_s24, 4294967280  ;;  %s219_s7 = sand.u32 1, %s819_s13  }
  0x4b   : > { %s534_s0 = sshll.u32 %s219_s7, 3  ;;  %s220_s6 = scalar_lea.sflag [#allocation8], %s219_s7 }
  0x4c   : > { %s223_s25 = scalar_lea.vmem [#allocation7], %s534_s0 }
  0x4d   : > { %802 = dma.done.wait (%p1003_p0), %s220_s6, 128  }
  0x4e   : > { %804 = vsyncadd (%p1003_p0), %s220_s6, 4294967168  ;;  %vm303_vm0 = vcmask 261120   ;;  %v266_v0 = vld [vmem:[%s223_s25] sm:$0xff]  ;;  %v296_v2 = vlaneseq  ;;  %v267_v5 = vld [vmem:[%s214_s22] sm:$0x1]  ;;  %v851_v16 = vmov 0  }
  0x4f   : > { %v304_v1 = vsel %vm303_vm0, %v266_v0, -inf  ;;  %vm269_vm2 = vcmp.ne.s32.totalorder %v267_v5, 4294967196  ;;  %vm271_vm3 = vcmask 57344   ;;  %648 = vset.pattern.permute.xlu0 %v851_v16  ;;  %647 = vset.pattern.permute.xlu1 %v851_v16  ;;  %vm263_vm4 = vcmask 0   ;;  %s535_s8 = sshll.u32 %s1026_s23, 3  ;;  %s541_s5 = sshll.u32 %s839_s18, 7 }
  0x50   : > { %305 = vmax.xlane.f32.xlu0 %v304_v1  ;;  %v297_v3 = vshrl.u32 %v296_v2, 7  ;;  %v316_v10 = vand.u32 127, %v296_v2  ;;  %v270_v17 = vsel %vm269_vm2, 1, %v851_v16  ;;  %265 = vst.msk [vmem:[#allocation3] sm:$0x1] %vm263_vm4, %v851_v16  ;;  %vm326_vm5 = vcmask 7168   ;;  %s393_s27 = scalar_lea.hbm %s1129_s3, %s541_s5 }
  0x51   : > { %v272_v18 = vsel %vm271_vm3, %v270_v17, 0  ;;  %v852_v42 = vmov 0.0   ;;  %s254_s10 = scalar_lea.vmem [#allocation10], %s535_s8  ;;  %s369_s24 = scalar_lea.sflag [#allocation11], %s1026_s23 }
  0x52   : > { %v298_v4 = vsub.s32 0, %v297_v3  ;;  %v274_v19 = vshrl.u32 %v272_v18, 16  ;;  %v273_v21 = vand.u32 65535, %v272_v18  ;;  %264 = vst.msk [vmem:[#allocation2] sm:$0x1] %vm263_vm4, %v852_v42  ;;  %s395_s26 = sshll.u32 %s254_s10, 4  ;;  %s396_s26 = int_to_ptr.vmem [resolvable:$true] %s395_s26 }
  0x53   : > { %s709_s22 = scalar_lea.vmem %s396_s26, 128  ;;  %s853_s7 = smov [#allocation10]  }
  0x54   : > { %v299_v6 = vrot.slane %v267_v5, %v298_v4  ;;  %v276_v20 = vcvt.s32.f32 %v274_v19  ;;  %v275_v22 = vcvt.s32.f32 %v273_v21  ;;  %p710_p8 = scmp.ne.s32.totalorder %s396_s26, %s709_s22  ;;  %s713_s0 = sshll.u32 %s853_s7, 4  ;;  %s714_s0 = int_to_ptr.vmem [resolvable:$false] %s713_s0 }
  0x55   : > { %s715_s6 = scalar_lea.vmem %s714_s0, 256  ;;  %p716_p1 = scmp.lt.s32.totalorder %s396_s26, %s714_s0 }
  0x56   : > { %p711_p2 = pnand %p710_p8, %p949_p9  ;;  %p717_p3 = scmp.lt.s32.totalorder %s715_s6, %s709_s22 }
  0x57   : > { %v268_v43 = vld [vmem:[#allocation3] sm:$0x1] }
  0x58   : > { %p712_p0 = pneg %p711_p2  ;;  %p718_p5 = por %p717_p3, %p716_p1 }
  0x59   : > { %v325_v54 = vld [vmem:[#allocation2] sm:$0x1] }
  0x5a   : > { %p719_p11 = pnand %p718_p5, %p712_p0 }
  0x66   : > { %301 = vbcast.lane.b32.xlu0 %v299_v6, 256 }
  0xd9   : > { %v306_v7 = vpop.xlane.xlu0 %305 }
  0xda   : > { %v307_v8 = vsub.f32 %v266_v0, %v306_v7 }
  0xdc   : > { %v308_v9 = vmul.f32 1.442695, %v307_v8 }
  0xdd   : > { %v302_v11 = vpop.permute.xlu0 %301 }
  0xde   : > { %649 = vpow2.f32 %v308_v9  ;;  %vm317_vm1 = vcmp.eq.s32.totalorder %v316_v10, %v302_v11  ;;  %vm322_vm6 = vcmp.ne.s32.totalorder %v302_v11, 4294967196 }
  0xdf   : > { %v318_v14 = vsel %vm317_vm1, %v307_v8, 0.0 }
  0xe0   : > { %v319_v15 = vsel %vm303_vm0, %v318_v14, 0.0 }
  0xeb   : > { %v650_v12 = vpop.eup %649 }
  0xec   : > { %v310_v13 = vsel %vm303_vm0, %v650_v12, 0.0 }
  0xed   : > { %311 = vadd.xlane.f32.xlu1 %v310_v13 }
  0xf1   : > { %320 = vadd.xlane.f32.xlu1 %v319_v15 }
  0xf5   : > { %279 = vadd.xlane.f32.xlu1 %v276_v20 }
  0xf9   : > { %277 = vadd.xlane.f32.xlu1 %v275_v22 }
 0x176   : > { %v312_v23 = vpop.xlane.xlu1 %311 }
 0x177   : > { %651 = vlog2.f32 %v312_v23 }
 0x17a   : > { %v321_v24 = vpop.xlane.xlu1 %320 }
 0x17e   : > { %v280_v26 = vpop.xlane.xlu1 %279 }
 0x17f   : > { %v282_v28 = vcvt.f32.s32 %v280_v26 }
 0x181   : > { %v283_v30 = vshll.u32 %v282_v28, 16 }
 0x182   : > { %v278_v31 = vpop.xlane.xlu1 %277 }
 0x183   : > { %v281_v33 = vcvt.f32.s32 %v278_v31 }
 0x184   : > { %v652_v25 = vpop.eup %651 }
 0x185   : > { %v314_v27 = vmul.f32 0.6931472, %v652_v25  ;;  %v284_v35 = vadd.s32 %v283_v30, %v281_v33 }
 0x187   : > { %v323_v29 = vsub.f32 %v314_v27, %v321_v24  ;;  %v285_v36 = vrot.slane %v284_v35, 4 }
 0x189   : > { %v324_v32 = vsel %vm322_vm6, %v323_v29, 0.0  ;;  %v286_v37 = vadd.s32 %v285_v36, %v284_v35 }
 0x18a   : > { %v327_v34 = vsel %vm326_vm5, %v324_v32, 0.0 }
 0x18b   : > { %328 = vadd.xlane.f32.xlu1 %v327_v34  ;;  %v287_v38 = vrot.slane %v286_v37, 2 }
 0x18d   : > { %v288_v39 = vadd.s32 %v287_v38, %v286_v37 }
 0x18f   : > { %v289_v40 = vrot.slane %v288_v39, 1 }
 0x191   : > { %v290_v41 = vadd.s32 %v289_v40, %v288_v39 }
 0x193   : > { %545 = vpush %v290_v41 }
 0x1c4   : > { %s546_s28 = spop %545 }
 0x1c5   : > { %v292_v44 = vstv %s546_s28 }
 0x1c6   : > { %v293_v45 = vadd.s32 %v292_v44, %v268_v43 }
 0x1c8   : > { %295 = vst.msk [vmem:[#allocation3] sm:$0x1] %vm263_vm4, %v293_v45 }
 0x1cf   : > { %v538_v46 = vld [vmem:[#allocation3] ss:$0 sm:$0xff] }
 0x1d0   : > { %360 = vperm.xlu0 %648, %v538_v46  }
 0x214   : > { %v329_v47 = vpop.xlane.xlu1 %328 }
 0x215   : > { %v330_v48 = vrot.slane %v329_v47, 4 }
 0x217   : > { %v331_v49 = vadd.f32 %v330_v48, %v329_v47 }
 0x219   : > { %v332_v50 = vrot.slane %v331_v49, 2 }
 0x21b   : > { %v333_v51 = vadd.f32 %v332_v50, %v331_v49 }
 0x21d   : > { %v334_v52 = vrot.slane %v333_v51, 1 }
 0x21f   : > { %v335_v53 = vadd.f32 %v334_v52, %v333_v51 }
 0x221   : > { %547 = vpush %v335_v53 }
 0x24b   : > { %v361_v55 = vpop.permute.xlu0 %360 }
 0x24c   : > { %362 = vst [vmem:[%s254_s10] sm:$0xff] %v361_v55 }
 0x252   : > { %s548_s12 = spop %547 }
 0x253   : > { %v337_v56 = vstv %s548_s12 }
 0x254   : > { %v338_v57 = vadd.f32 %v337_v56, %v325_v54 }
 0x256   : > { %339 = vst.msk [vmem:[#allocation2] sm:$0x1] %vm263_vm4, %v338_v57 }
 0x257   : > { %722 = shalt.err (!%p719_p11)
}
 0x258   : > { %s723_s25 = scalar_lea.hbm %s393_s27, 128  ;;  %s727_s10 = scalar_lea.hbm %s1129_s3, 256 }
 0x259   : > { %p724_p12 = scmp.ne.s32.totalorder %s393_s27, %s723_s25  ;;  %p728_p7 = scmp.lt.s32.totalorder %s393_s27, %s1129_s3 }
 0x25a   : > { %p729_p10 = scmp.lt.s32.totalorder %s727_s10, %s723_s25 }
 0x25b   : > { %p725_p13 = pnand %p724_p12, %p949_p9 }
 0x25c   : > { %p730_p4 = por %p729_p10, %p728_p7 }
 0x25d   : > { %p726_p6 = pneg %p725_p13 }
 0x25f   : > { %p731_p8 = pnand %p730_p4, %p726_p6 }
 0x261   : > { %734 = shalt.err (!%p731_p8)
}
 0x262   : > { %554 = dma.vmem_to_hbm [thread:$0]  (%p949_p9), %s396_s26, 128, %s393_s27, %s369_s24   ;;  %v537_v58 = vld [vmem:[#allocation2] ss:$0 sm:$0xff] }
 0x263   : > { %350 = vperm.xlu1 %647, %v537_v58   ;;  %s247_s22 = scalar_lea.vmem [#allocation9], %s535_s8  ;;  %s380_s25 = scalar_lea.hbm %s1128_s2, %s541_s5 }
 0x264   : > { %s382_s7 = sshll.u32 %s247_s22, 4  ;;  %s364_s28 = scalar_lea.sflag [#allocation6], %s1026_s23  ;;  %s1070_s7 = int_to_ptr.vmem [resolvable:$true] %s382_s7 }
 0x265   : > { %s735_s12 = scalar_lea.vmem %s1070_s7, 128  ;;  %s854_s8 = smov [#allocation9]  }
 0x266   : > { %p736_p2 = scmp.ne.s32.totalorder %s1070_s7, %s735_s12  ;;  %s739_s26 = sshll.u32 %s854_s8, 4  ;;  %s740_s26 = int_to_ptr.vmem [resolvable:$false] %s739_s26 }
 0x267   : > { %s741_s27 = scalar_lea.vmem %s740_s26, 256  ;;  %p742_p3 = scmp.lt.s32.totalorder %s1070_s7, %s740_s26 }
 0x268   : > { %p737_p0 = pnand %p736_p2, %p949_p9  ;;  %p743_p5 = scmp.lt.s32.totalorder %s741_s27, %s735_s12 }
 0x26a   : > { %p738_p1 = pneg %p737_p0  ;;  %p744_p11 = por %p743_p5, %p742_p3 }
 0x26c   : > { %p745_p12 = pnand %p744_p11, %p738_p1 }
 0x2de   : > { %v351_v59 = vpop.permute.xlu1 %350 }
 0x2df   : > { %353 = vst [vmem:[%s247_s22] sm:$0xff] %v351_v59 }
 0x2e0   : > { %748 = shalt.err (!%p745_p12)
}
 0x2e1   : > { %s749_s18 = scalar_lea.hbm %s380_s25, 128  ;;  %s753_s24 = scalar_lea.hbm %s1128_s2, 256 }
 0x2e2   : > { %p750_p13 = scmp.ne.s32.totalorder %s380_s25, %s749_s18  ;;  %p754_p10 = scmp.lt.s32.totalorder %s380_s25, %s1128_s2 }
 0x2e3   : > { %p755_p4 = scmp.lt.s32.totalorder %s753_s24, %s749_s18 }
 0x2e4   : > { %p751_p6 = pnand %p750_p13, %p949_p9 }
 0x2e5   : > { %p756_p8 = por %p755_p4, %p754_p10 }
 0x2e6   : > { %p752_p7 = pneg %p751_p6 }
 0x2e8   : > { %p757_p2 = pnand %p756_p8, %p752_p7 }
 0x2ea   : > { %760 = shalt.err (!%p757_p2)
}
 0x2eb   : > { %553 = dma.vmem_to_hbm [thread:$0]  (%p949_p9), %s1070_s7, 128, %s380_s25, %s364_s28  }
 0x2ec PF: > { %s407_s21 = sand.u32 1, %s827_s15   ;;  %p1147_p0 = scmp.ne.s32.totalorder %s1139_s4, 0 }
 0x2ed   : > { %p1148_p1 = scmp.ge.s32.totalorder %s847_s20, 2  ;;  %s408_s22 = scalar_lea.sflag [#allocation6], %s407_s21 }
 0x2ef   : > { %p565_p3 = pnand %p1148_p1, %p1147_p0 }
 0x2f1   : > { %p566_p5 = pneg %p565_p3 }
 0x2f3   : > { %806 = dma.done.wait (%p566_p5), %s408_s22, 128  }
 0x2f4   : > { %808 = vsyncadd (%p566_p5), %s408_s22, 4294967168  ;;  %s417_s0 = scalar_lea.sflag [#allocation11], %s407_s21 }
 0x2f5   : > { %810 = dma.done.wait (%p566_p5), %s417_s0, 128  }
 0x2f6   : > { %812 = vsyncadd (%p566_p5), %s417_s0, 4294967168  ;;  %s26_s20 = sadd.s32 1, %s847_s20   ;;  %s1149_s29 = sld [smem:[#allocation16_spill]] }
 0x2f7   : > { %p23_p11 = scmp.ge.s32.totalorder %s26_s20, 4   ;;  %s1150_s12 = smov %s819_s13 }
 0x2f8   : > { %s1151_s13 = smov %s823_s14  ;;  %s1152_s14 = smov %s1008_s11 }
 0x2f9   : > { %s1153_s15 = smov %s831_s16  ;;  %s1154_s16 = smov %s835_s17 }
 0x2fa   : > { %s1155_s17 = smov %s954_s30  ;;  %s1156_s18 = smov %s843_s19 }
 0x2fb   :  { %25 = sbr.rel (!%p23_p11) target bundleno = 14 (0xe), region = 111 }
 0x2fc   : > { %s1157_s19 = smov %s1149_s29 }
 0x300   :  { %422 = vsyncpa [#allocation5], 1 }
 0x301   :  { %424 = vsyncpa [#allocation5 + $0x1], 1 }
 0x302   :  { %425 = vsyncpa [#allocation8], 1 }
 0x303   :  { %427 = vsyncpa [#allocation8 + $0x1], 1 }
 0x304   :  { %428 = vsyncpa [#allocation6], 1 }
 0x305   :  { %430 = vsyncpa [#allocation6 + $0x1], 1 }
 0x306   :  { %431 = vsyncpa [#allocation11], 1 }
 0x307   :  { %433 = vsyncpa [#allocation11 + $0x1], 1 }

</bundles_post_ra>
